<compile_context>
chip_gen: v5e
topology: v5e:2x2
jax: 0.10.0
libtpu: 0.0.40
codegen_flags: <defaults>
</compile_context>

<pallas_src>
import math
import numpy as np
import jax
import jax.numpy as jnp
from jax.experimental import pallas as pl

# ---- model hyperparameters (small, consistent with the module) ----
BATCH = 2
SEQ = 8
INPUT_DIM = 32          # embed_dim == input_dim in EncoderBlock
NUM_HEADS = 4
HEAD_DIM = INPUT_DIM // NUM_HEADS
DIM_FF = 64
LN_EPS = 1e-5
NTOK = BATCH * SEQ      # 16 rows; all vector params are pre-broadcast to this

# ---- packed parameter-slab layout (all slices sublane-aligned, start at lane 0) ----
_R_WQKV = 0                                   # (D, 3D) fused QKV weight (Q cols pre-scaled)
_R_WO = _R_WQKV + INPUT_DIM                   # 32   (D, D)
_R_W1 = _R_WO + INPUT_DIM                     # 64   (D, F)
_R_W2 = _R_W1 + INPUT_DIM                     # 96   (F, D)
_R_MASK = _R_W2 + DIM_FF                      # 160  (H*S, D) head-block 0/1 mask
_R_ONES = _R_MASK + NUM_HEADS * SEQ           # 192  (H*S, H*S) block-diag ones
_R_BQKV = _R_ONES + NUM_HEADS * SEQ           # 224  (NTOK, 3D)
_R_BO = _R_BQKV + NTOK                        # 240  (NTOK, D)
_R_G1 = _R_BO + NTOK                          # 256
_R_BE1 = _R_G1 + NTOK                         # 272
_R_B1 = _R_BE1 + NTOK                         # 288  (NTOK, F)
_R_B2 = _R_B1 + NTOK                          # 304
_R_G2 = _R_B2 + NTOK                          # 320
_R_BE2 = _R_G2 + NTOK                         # 336
SLAB_ROWS = _R_BE2 + NTOK                     # 352 (multiple of 8)
SLAB_COLS = 128                               # lane-dense slab width


def _layernorm(x, gamma, beta):
    # gamma/beta arrive already broadcast to (NTOK, D) -> pure aligned vreg ops.
    mu = jnp.mean(x, axis=-1, keepdims=True)
    xc = x - mu
    var = jnp.mean(xc * xc, axis=-1, keepdims=True)
    return xc * jax.lax.rsqrt(var + LN_EPS) * gamma + beta


def encoder_block_kernel(x_ref, p_ref, out_ref):
    N, D = x_ref.shape                      # (16, 32)
    B, S, H, F = BATCH, SEQ, NUM_HEADS, DIM_FF
    HS = H * S

    x = x_ref[...]                          # (N, D)

    # ---- unpack parameter slab (static, sublane-aligned slices) ----
    wqkv = p_ref[_R_WQKV:_R_WQKV + D, 0:3 * D]
    wo = p_ref[_R_WO:_R_WO + D, 0:D]
    w1 = p_ref[_R_W1:_R_W1 + D, 0:F]
    w2 = p_ref[_R_W2:_R_W2 + F, 0:D]
    mexp = p_ref[_R_MASK:_R_MASK + HS, 0:D]       # (H*S, D) head-block mask
    ones_bd = p_ref[_R_ONES:_R_ONES + HS, 0:HS]   # (H*S, H*S) block-diag ones
    bqkv = p_ref[_R_BQKV:_R_BQKV + N, 0:3 * D]
    bo = p_ref[_R_BO:_R_BO + N, 0:D]
    g1 = p_ref[_R_G1:_R_G1 + N, 0:D]
    be1 = p_ref[_R_BE1:_R_BE1 + N, 0:D]
    b1 = p_ref[_R_B1:_R_B1 + N, 0:F]
    b2 = p_ref[_R_B2:_R_B2 + N, 0:D]
    g2 = p_ref[_R_G2:_R_G2 + N, 0:D]
    be2 = p_ref[_R_BE2:_R_BE2 + N, 0:D]

    # ---- fused QKV projection (1 MXU push; 1/sqrt(HD) already folded into Q) ----
    qkv = jnp.dot(x, wqkv, preferred_element_type=jnp.float32) + bqkv   # (N, 3D)
    q = qkv[:, 0:D].reshape(B, S, D)
    k = qkv[:, D:2 * D].reshape(B, S, D)
    v = qkv[:, 2 * D:3 * D].reshape(B, S, D)

    # ---- block-diagonal multi-head attention (mask=None path) ----
    # K_exp/V_exp: (B, H*S, D); rows of head h keep only head h's feature block
    # (zeros elsewhere drop out of the contractions).
    k_exp = jnp.broadcast_to(k.reshape(B, 1, S, D), (B, H, S, D)).reshape(B, HS, D) * mexp
    v_exp = jnp.broadcast_to(v.reshape(B, 1, S, D), (B, H, S, D)).reshape(B, HS, D) * mexp

    # logits[b, i, h*S + j] = <q_b[i, head h block], k_b[j, head h block]>  (pre-scaled)
    logits = jnp.einsum("bqd,bkd->bqk", q, k_exp,
                        preferred_element_type=jnp.float32)             # (B, S, H*S)

    # Per-head softmax over the key axis. Global row max is a valid shift for
    # every 8-lane head segment; the per-segment denominator comes from one
    # matmul against the block-diagonal ones matrix (already broadcast).
    m = jnp.max(logits, axis=-1, keepdims=True)
    p_un = jnp.exp(logits - m).reshape(N, HS)                            # (N, H*S)
    denom = jnp.dot(p_un, ones_bd, preferred_element_type=jnp.float32)   # segment sums
    probs = (p_un / denom).reshape(B, S, HS)

    # vals[b, i, h*HD + d] = sum_j probs_head_h[i, j] * v_head_h[j, d]
    vals = jnp.einsum("bqk,bkd->bqd", probs, v_exp,
                      preferred_element_type=jnp.float32)                # (B, S, D)
    values = vals.reshape(N, D)                                          # head-major concat
    attn_out = jnp.dot(values, wo, preferred_element_type=jnp.float32) + bo

    # ---- residual + LayerNorm 1 ----
    x1 = _layernorm(x + attn_out, g1, be1)

    # ---- feed-forward MLP: Linear -> (Dropout=0) -> ReLU -> Linear ----
    h = jnp.maximum(jnp.dot(x1, w1, preferred_element_type=jnp.float32) + b1, 0.0)
    mlp = jnp.dot(h, w2, preferred_element_type=jnp.float32) + b2

    # ---- residual + LayerNorm 2 ----
    out_ref[...] = _layernorm(x1 + mlp, g2, be2)


def encoder_block(x, param_slab):
    B, S, D = x.shape
    assert (B, S, D) == (BATCH, SEQ, INPUT_DIM)
    x2d = x.reshape(B * S, D)                 # flatten in the wrapper (free in XLA)
    nbytes = (x2d.size + param_slab.size + x2d.size) * 4
    out2d = pl.pallas_call(
        encoder_block_kernel,
        out_shape=jax.ShapeDtypeStruct((B * S, D), jnp.float32),
        cost_estimate=pl.CostEstimate(flops=360_000, transcendentals=600,
                                      bytes_accessed=nbytes),
    )(x2d, param_slab)
    return out2d.reshape(B, S, D)


# ---- host-side parameter handling ----
def _qkv_col_perms():
    # torch packs qkv output columns per head as [q_h | k_h | v_h]; split into
    # head-major Q / K / V column permutations.
    idx = np.arange(3 * INPUT_DIM).reshape(NUM_HEADS, 3, HEAD_DIM)
    return (idx[:, 0, :].reshape(-1),   # Q columns, head-major
            idx[:, 1, :].reshape(-1),   # K columns
            idx[:, 2, :].reshape(-1))   # V columns


def pack_params(p):
    D, F = INPUT_DIM, DIM_FF
    perm_q, perm_k, perm_v = _qkv_col_perms()
    perm = np.concatenate([perm_q, perm_k, perm_v])
    # Fold the attention scale into the Q columns (weights and bias).
    col_scale = np.concatenate([np.full(D, 1.0 / math.sqrt(HEAD_DIM)),
                                np.ones(2 * D)]).astype(np.float32)
    wqkv = np.asarray(p["wqkv"])[:, perm] * col_scale
    bqkv = np.asarray(p["bqkv"])[0][perm] * col_scale

    slab = np.zeros((SLAB_ROWS, SLAB_COLS), np.float32)
    slab[_R_WQKV:_R_WQKV + D, 0:3 * D] = wqkv
    slab[_R_WO:_R_WO + D, 0:D] = np.asarray(p["wo"])
    slab[_R_W1:_R_W1 + D, 0:F] = np.asarray(p["w1"])
    slab[_R_W2:_R_W2 + F, 0:D] = np.asarray(p["w2"])

    # Head-block mask (H*S, D): row h*S+j keeps feature columns of head h.
    row_head = np.arange(NUM_HEADS * SEQ) // SEQ
    col_head = np.arange(D) // HEAD_DIM
    slab[_R_MASK:_R_MASK + NUM_HEADS * SEQ, 0:D] = \
        (row_head[:, None] == col_head[None, :]).astype(np.float32)
    # Block-diagonal ones (H*S, H*S): per-head softmax denominator matmul.
    key_head = np.arange(NUM_HEADS * SEQ) // SEQ
    slab[_R_ONES:_R_ONES + NUM_HEADS * SEQ, 0:NUM_HEADS * SEQ] = \
        (key_head[:, None] == key_head[None, :]).astype(np.float32)

    # Pre-broadcast every 1-row vector param to NTOK rows (aligned vreg adds).
    def put(row, vec, width):
        slab[row:row + NTOK, 0:width] = np.broadcast_to(
            np.asarray(vec, np.float32).reshape(1, width), (NTOK, width))

    put(_R_BQKV, bqkv, 3 * D)
    put(_R_BO, p["bo"][0], D)
    put(_R_G1, p["g1"][0], D)
    put(_R_BE1, p["be1"][0], D)
    put(_R_B1, p["b1"][0], F)
    put(_R_B2, p["b2"][0], D)
    put(_R_G2, p["g2"][0], D)
    put(_R_BE2, p["be2"][0], D)
    return jnp.asarray(slab)


def xavier_uniform(key, fan_in, fan_out):
    bound = math.sqrt(6.0 / (fan_in + fan_out))
    return jax.random.uniform(key, (fan_in, fan_out), jnp.float32, -bound, bound)


def make_params(key):
    k1, k2, k3, k4 = jax.random.split(key, 4)
    D, F = INPUT_DIM, DIM_FF
    return {
        # attention (weights stored as (in, out); torch Linear would be (out, in))
        "wqkv": xavier_uniform(k1, D, 3 * D),
        "bqkv": jnp.zeros((1, 3 * D), jnp.float32),
        "wo": xavier_uniform(k2, D, D),
        "bo": jnp.zeros((1, D), jnp.float32),
        # layer norms (torch default init: gamma=1, beta=0)
        "g1": jnp.ones((1, D), jnp.float32),
        "be1": jnp.zeros((1, D), jnp.float32),
        "g2": jnp.ones((1, D), jnp.float32),
        "be2": jnp.zeros((1, D), jnp.float32),
        # MLP
        "w1": xavier_uniform(k3, D, F),
        "b1": jnp.zeros((1, F), jnp.float32),
        "w2": xavier_uniform(k4, F, D),
        "b2": jnp.zeros((1, D), jnp.float32),
    }


def encoder_block_ref(x, p):
    """Pure-JAX reference mirroring the PyTorch forward (mask=None, torch qkv layout)."""
    B, S, D = x.shape
    qkv = x @ p["wqkv"] + p["bqkv"][0]
    qkv = qkv.reshape(B, S, NUM_HEADS, 3 * HEAD_DIM).transpose(0, 2, 1, 3)
    q, k, v = jnp.split(qkv, 3, axis=-1)
    logits = jnp.einsum("bhqd,bhkd->bhqk", q, k) / math.sqrt(HEAD_DIM)
    attn = jax.nn.softmax(logits, axis=-1)
    vals = jnp.einsum("bhqk,bhkd->bhqd", attn, v).transpose(0, 2, 1, 3).reshape(B, S, D)
    o = vals @ p["wo"] + p["bo"][0]
    x = x + o
    x = (x - x.mean(-1, keepdims=True)) / jnp.sqrt(x.var(-1, keepdims=True) + LN_EPS)
    x = x * p["g1"][0] + p["be1"][0]
    h = jnp.maximum(x @ p["w1"] + p["b1"][0], 0.0)
    m = h @ p["w2"] + p["b2"][0]
    x = x + m
    x = (x - x.mean(-1, keepdims=True)) / jnp.sqrt(x.var(-1, keepdims=True) + LN_EPS)
    return x * p["g2"][0] + p["be2"][0]


if __name__ == "__main__":
    key = jax.random.PRNGKey(0)
    kx, kp = jax.random.split(key)
    x = jax.random.normal(kx, (BATCH, SEQ, INPUT_DIM), jnp.float32)
    params = make_params(kp)
    slab = pack_params(params)

    out = jax.block_until_ready(encoder_block(x, slab))

    ref = encoder_block_ref(x, params)
    # Exact softmax denominator (no approx reciprocal) -> tight tolerance again.
    assert jnp.allclose(out, ref, atol=1e-4, rtol=1e-4), "mismatch vs reference"
    print("KERNEL_OK")
</pallas_src>

<mosaic_0001>
module attributes {stable_mosaic.version = 11 : i64} {
  func.func @encoder_block_kernel(%arg0: memref<16x32xf32, #tpu.memory_space<vmem>>, %arg1: memref<352x128xf32, #tpu.memory_space<vmem>>, %arg2: memref<16x32xf32, #tpu.memory_space<vmem>>) attributes {dimension_semantics = [], scalar_prefetch = 0 : i64, scratch_operands = 0 : i64, tpu.core_type = #tpu.core_type<tc>} {
    %c0 = arith.constant 0 : index
    %c0_0 = arith.constant 0 : index
    %0 = vector.load %arg0[%c0, %c0_0] : memref<16x32xf32, #tpu.memory_space<vmem>>, vector<16x32xf32>
    %c0_1 = arith.constant 0 : index
    %c0_2 = arith.constant 0 : index
    %1 = vector.load %arg1[%c0_1, %c0_2] : memref<352x128xf32, #tpu.memory_space<vmem>>, vector<32x96xf32>
    %c32 = arith.constant 32 : index
    %c0_3 = arith.constant 0 : index
    %2 = vector.load %arg1[%c32, %c0_3] : memref<352x128xf32, #tpu.memory_space<vmem>>, vector<32x32xf32>
    %c64 = arith.constant 64 : index
    %c0_4 = arith.constant 0 : index
    %3 = vector.load %arg1[%c64, %c0_4] : memref<352x128xf32, #tpu.memory_space<vmem>>, vector<32x64xf32>
    %c96 = arith.constant 96 : index
    %c0_5 = arith.constant 0 : index
    %4 = vector.load %arg1[%c96, %c0_5] : memref<352x128xf32, #tpu.memory_space<vmem>>, vector<64x32xf32>
    %c160 = arith.constant 160 : index
    %c0_6 = arith.constant 0 : index
    %5 = vector.load %arg1[%c160, %c0_6] : memref<352x128xf32, #tpu.memory_space<vmem>>, vector<32x32xf32>
    %c192 = arith.constant 192 : index
    %c0_7 = arith.constant 0 : index
    %6 = vector.load %arg1[%c192, %c0_7] : memref<352x128xf32, #tpu.memory_space<vmem>>, vector<32x32xf32>
    %c224 = arith.constant 224 : index
    %c0_8 = arith.constant 0 : index
    %7 = vector.load %arg1[%c224, %c0_8] : memref<352x128xf32, #tpu.memory_space<vmem>>, vector<16x96xf32>
    %c240 = arith.constant 240 : index
    %c0_9 = arith.constant 0 : index
    %8 = vector.load %arg1[%c240, %c0_9] : memref<352x128xf32, #tpu.memory_space<vmem>>, vector<16x32xf32>
    %c256 = arith.constant 256 : index
    %c0_10 = arith.constant 0 : index
    %9 = vector.load %arg1[%c256, %c0_10] : memref<352x128xf32, #tpu.memory_space<vmem>>, vector<16x32xf32>
    %c272 = arith.constant 272 : index
    %c0_11 = arith.constant 0 : index
    %10 = vector.load %arg1[%c272, %c0_11] : memref<352x128xf32, #tpu.memory_space<vmem>>, vector<16x32xf32>
    %c288 = arith.constant 288 : index
    %c0_12 = arith.constant 0 : index
    %11 = vector.load %arg1[%c288, %c0_12] : memref<352x128xf32, #tpu.memory_space<vmem>>, vector<16x64xf32>
    %c304 = arith.constant 304 : index
    %c0_13 = arith.constant 0 : index
    %12 = vector.load %arg1[%c304, %c0_13] : memref<352x128xf32, #tpu.memory_space<vmem>>, vector<16x32xf32>
    %c320 = arith.constant 320 : index
    %c0_14 = arith.constant 0 : index
    %13 = vector.load %arg1[%c320, %c0_14] : memref<352x128xf32, #tpu.memory_space<vmem>>, vector<16x32xf32>
    %c336 = arith.constant 336 : index
    %c0_15 = arith.constant 0 : index
    %14 = vector.load %arg1[%c336, %c0_15] : memref<352x128xf32, #tpu.memory_space<vmem>>, vector<16x32xf32>
    %cst = arith.constant dense<0.000000e+00> : vector<16x96xf32>
    %15 = tpu.matmul %0, %1, %cst {dimension_numbers = #tpu.dot_dimension_numbers<[1], [0], [0], [1], [0, 0, 1, 1], [], []>} : vector<16x32xf32>, vector<32x96xf32>, vector<16x96xf32> -> vector<16x96xf32>
    %16 = arith.addf %15, %7 : vector<16x96xf32>
    %17 = vector.extract_strided_slice %16 {offsets = [0, 0], sizes = [16, 32], strides = [1, 1]} : vector<16x96xf32> to vector<16x32xf32>
    %18 = vector.shape_cast %17 : vector<16x32xf32> to vector<2x8x32xf32>
    %19 = vector.extract_strided_slice %16 {offsets = [0, 32], sizes = [16, 32], strides = [1, 1]} : vector<16x96xf32> to vector<16x32xf32>
    %20 = vector.shape_cast %19 : vector<16x32xf32> to vector<2x8x32xf32>
    %21 = vector.extract_strided_slice %16 {offsets = [0, 64], sizes = [16, 32], strides = [1, 1]} : vector<16x96xf32> to vector<16x32xf32>
    %22 = vector.shape_cast %21 : vector<16x32xf32> to vector<2x8x32xf32>
    %23 = vector.shape_cast %20 : vector<2x8x32xf32> to vector<2x1x8x32xf32>
    %24 = vector.shape_cast %23 : vector<2x1x8x32xf32> to vector<2x1x8x32xf32>
    %25 = vector.broadcast %24 : vector<2x1x8x32xf32> to vector<2x4x8x32xf32>
    %26 = vector.shape_cast %25 : vector<2x4x8x32xf32> to vector<2x32x32xf32>
    %27 = vector.shape_cast %5 : vector<32x32xf32> to vector<1x32x32xf32>
    %28 = vector.broadcast %27 : vector<1x32x32xf32> to vector<2x32x32xf32>
    %29 = arith.mulf %26, %28 : vector<2x32x32xf32>
    %30 = vector.shape_cast %22 : vector<2x8x32xf32> to vector<2x1x8x32xf32>
    %31 = vector.shape_cast %30 : vector<2x1x8x32xf32> to vector<2x1x8x32xf32>
    %32 = vector.broadcast %31 : vector<2x1x8x32xf32> to vector<2x4x8x32xf32>
    %33 = vector.shape_cast %32 : vector<2x4x8x32xf32> to vector<2x32x32xf32>
    %34 = vector.shape_cast %5 : vector<32x32xf32> to vector<1x32x32xf32>
    %35 = vector.broadcast %34 : vector<1x32x32xf32> to vector<2x32x32xf32>
    %36 = arith.mulf %33, %35 : vector<2x32x32xf32>
    "tpu.trace_start"() <{level = 10 : i32, message = "bqd,bkd->bqk"}> : () -> ()
    %cst_16 = arith.constant dense<0.000000e+00> : vector<2x8x32xf32>
    %37 = tpu.matmul %18, %29, %cst_16 {dimension_numbers = #tpu.dot_dimension_numbers<[2], [2], [1], [1], [0, 0, 0, 1, 1, 1], [0], [0]>} : vector<2x8x32xf32>, vector<2x32x32xf32>, vector<2x8x32xf32> -> vector<2x8x32xf32>
    "tpu.trace_stop"() : () -> ()
    %cst_17 = arith.constant dense<0xFF800000> : vector<2x8xf32>
    %38 = vector.multi_reduction <maximumf>, %37, %cst_17 [2] : vector<2x8x32xf32> to vector<2x8xf32>
    %39 = vector.shape_cast %38 : vector<2x8xf32> to vector<2x8x1xf32>
    %40 = vector.broadcast %39 : vector<2x8x1xf32> to vector<2x8x32xf32>
    %41 = arith.subf %37, %40 : vector<2x8x32xf32>
    %42 = math.exp %41 : vector<2x8x32xf32>
    %43 = vector.shape_cast %42 : vector<2x8x32xf32> to vector<16x32xf32>
    %cst_18 = arith.constant dense<0.000000e+00> : vector<16x32xf32>
    %44 = tpu.matmul %43, %6, %cst_18 {dimension_numbers = #tpu.dot_dimension_numbers<[1], [0], [0], [1], [0, 0, 1, 1], [], []>} : vector<16x32xf32>, vector<32x32xf32>, vector<16x32xf32> -> vector<16x32xf32>
    %45 = arith.divf %43, %44 : vector<16x32xf32>
    %46 = vector.shape_cast %45 : vector<16x32xf32> to vector<2x8x32xf32>
    "tpu.trace_start"() <{level = 10 : i32, message = "bqk,bkd->bqd"}> : () -> ()
    %cst_19 = arith.constant dense<0.000000e+00> : vector<2x8x32xf32>
    %47 = tpu.matmul %46, %36, %cst_19 {dimension_numbers = #tpu.dot_dimension_numbers<[2], [1], [1], [2], [0, 0, 0, 1, 1, 2], [0], [0]>} : vector<2x8x32xf32>, vector<2x32x32xf32>, vector<2x8x32xf32> -> vector<2x8x32xf32>
    "tpu.trace_stop"() : () -> ()
    %48 = vector.shape_cast %47 : vector<2x8x32xf32> to vector<16x32xf32>
    %cst_20 = arith.constant dense<0.000000e+00> : vector<16x32xf32>
    %49 = tpu.matmul %48, %2, %cst_20 {dimension_numbers = #tpu.dot_dimension_numbers<[1], [0], [0], [1], [0, 0, 1, 1], [], []>} : vector<16x32xf32>, vector<32x32xf32>, vector<16x32xf32> -> vector<16x32xf32>
    %50 = arith.addf %49, %8 : vector<16x32xf32>
    %51 = arith.addf %0, %50 : vector<16x32xf32>
    %cst_21 = arith.constant dense<0.000000e+00> : vector<16xf32>
    %52 = vector.multi_reduction <add>, %51, %cst_21 [1] : vector<16x32xf32> to vector<16xf32>
    %53 = vector.shape_cast %52 : vector<16xf32> to vector<16x1xf32>
    %cst_22 = arith.constant 3.200000e+01 : f32
    %54 = vector.broadcast %cst_22 : f32 to vector<16x1xf32>
    %55 = arith.divf %53, %54 : vector<16x1xf32>
    %56 = vector.broadcast %55 : vector<16x1xf32> to vector<16x32xf32>
    %57 = arith.subf %51, %56 : vector<16x32xf32>
    %58 = arith.mulf %57, %57 : vector<16x32xf32>
    %cst_23 = arith.constant dense<0.000000e+00> : vector<16xf32>
    %59 = vector.multi_reduction <add>, %58, %cst_23 [1] : vector<16x32xf32> to vector<16xf32>
    %60 = vector.shape_cast %59 : vector<16xf32> to vector<16x1xf32>
    %cst_24 = arith.constant 3.200000e+01 : f32
    %61 = vector.broadcast %cst_24 : f32 to vector<16x1xf32>
    %62 = arith.divf %60, %61 : vector<16x1xf32>
    %cst_25 = arith.constant 9.99999974E-6 : f32
    %63 = vector.broadcast %cst_25 : f32 to vector<16x1xf32>
    %64 = arith.addf %62, %63 : vector<16x1xf32>
    %65 = math.rsqrt %64 : vector<16x1xf32>
    %66 = vector.broadcast %65 : vector<16x1xf32> to vector<16x32xf32>
    %67 = arith.mulf %57, %66 : vector<16x32xf32>
    %68 = arith.mulf %67, %9 : vector<16x32xf32>
    %69 = arith.addf %68, %10 : vector<16x32xf32>
    %cst_26 = arith.constant dense<0.000000e+00> : vector<16x64xf32>
    %70 = tpu.matmul %69, %3, %cst_26 {dimension_numbers = #tpu.dot_dimension_numbers<[1], [0], [0], [1], [0, 0, 1, 1], [], []>} : vector<16x32xf32>, vector<32x64xf32>, vector<16x64xf32> -> vector<16x64xf32>
    %71 = arith.addf %70, %11 : vector<16x64xf32>
    %cst_27 = arith.constant 0.000000e+00 : f32
    %72 = vector.broadcast %cst_27 : f32 to vector<16x64xf32>
    %73 = arith.maximumf %71, %72 : vector<16x64xf32>
    %cst_28 = arith.constant dense<0.000000e+00> : vector<16x32xf32>
    %74 = tpu.matmul %73, %4, %cst_28 {dimension_numbers = #tpu.dot_dimension_numbers<[1], [0], [0], [1], [0, 0, 1, 1], [], []>} : vector<16x64xf32>, vector<64x32xf32>, vector<16x32xf32> -> vector<16x32xf32>
    %75 = arith.addf %74, %12 : vector<16x32xf32>
    %76 = arith.addf %69, %75 : vector<16x32xf32>
    %cst_29 = arith.constant dense<0.000000e+00> : vector<16xf32>
    %77 = vector.multi_reduction <add>, %76, %cst_29 [1] : vector<16x32xf32> to vector<16xf32>
    %78 = vector.shape_cast %77 : vector<16xf32> to vector<16x1xf32>
    %cst_30 = arith.constant 3.200000e+01 : f32
    %79 = vector.broadcast %cst_30 : f32 to vector<16x1xf32>
    %80 = arith.divf %78, %79 : vector<16x1xf32>
    %81 = vector.broadcast %80 : vector<16x1xf32> to vector<16x32xf32>
    %82 = arith.subf %76, %81 : vector<16x32xf32>
    %83 = arith.mulf %82, %82 : vector<16x32xf32>
    %cst_31 = arith.constant dense<0.000000e+00> : vector<16xf32>
    %84 = vector.multi_reduction <add>, %83, %cst_31 [1] : vector<16x32xf32> to vector<16xf32>
    %85 = vector.shape_cast %84 : vector<16xf32> to vector<16x1xf32>
    %cst_32 = arith.constant 3.200000e+01 : f32
    %86 = vector.broadcast %cst_32 : f32 to vector<16x1xf32>
    %87 = arith.divf %85, %86 : vector<16x1xf32>
    %cst_33 = arith.constant 9.99999974E-6 : f32
    %88 = vector.broadcast %cst_33 : f32 to vector<16x1xf32>
    %89 = arith.addf %87, %88 : vector<16x1xf32>
    %90 = math.rsqrt %89 : vector<16x1xf32>
    %91 = vector.broadcast %90 : vector<16x1xf32> to vector<16x32xf32>
    %92 = arith.mulf %82, %91 : vector<16x32xf32>
    %93 = arith.mulf %92, %13 : vector<16x32xf32>
    %94 = arith.addf %93, %14 : vector<16x32xf32>
    %c0_34 = arith.constant 0 : index
    %c0_35 = arith.constant 0 : index
    %95 = vector.load %arg2[%c0_34, %c0_35] : memref<16x32xf32, #tpu.memory_space<vmem>>, vector<16x32xf32>
    tpu.vector_store %arg2[%c0_34, %c0_35], %94 {strides = array<i32>} : memref<16x32xf32, #tpu.memory_space<vmem>>, vector<16x32xf32>,
    return
  }
}

</mosaic_0001>

<bundles_post_ra>
// kernel: tpu_custom_call.1
= control target key start
LH: loop header
LB: loop body
LE: loop exit
PB: predicated region body
PF: predicated region fallthrough
CT: control target
= control target key end

     0   :  { %7 = vsyncpa [#allocation3], 0  ;;  %s876_s0 = inlined_call_operand.hbm [shape: f32[16,32], index: 0, kind: input, shape index: {}]   ;;  %s877_s1 = inlined_call_operand.hbm [shape: f32[352,128], index: 1, kind: input, shape index: {}]   ;;  %s878_s2 = inlined_call_operand.hbm [shape: f32[16,32], index: 2, kind: output, shape index: {}]  }
   0x1   :  { %8 = vsyncpa [#allocation6], 0 }
   0x2   :  { %9 = vsyncpa [#allocation4], 0  ;;  %s14_s11 = sshll.u32 %s876_s0, 4  ;;  %s765_s12 = smov [#allocation2]   ;;  %s15_s11 = int_to_ptr.hbm [resolvable:$true] %s14_s11 }
   0x3   :  { %s16_s13 = sshll.u32 %s765_s12, 4  ;;  %s27_s16 = sshll.u32 %s877_s1, 4  ;;  %s17_s13 = int_to_ptr.vmem [resolvable:$true] %s16_s13  ;;  %s28_s16 = int_to_ptr.hbm [resolvable:$true] %s27_s16 }
   0x4   :  { %s766_s17 = smov 128   ;;  %s767_s18 = smov 8  }
   0x5   :  { %22 = dma.hbm_to_vmem [thread:$0]  %s15_s11, 256, %s17_s13, [#allocation3], %s766_s17, %s766_s17, %s767_s18  }
   0x6   :  { %s768_s19 = smov [#allocation5]  }
   0x7   :  { %s29_s20 = sshll.u32 %s768_s19, 4  ;;  %s30_s20 = int_to_ptr.vmem [resolvable:$true] %s29_s20 }
   0x8   :  { %35 = dma.hbm_to_vmem [thread:$0]  %s28_s16, 5632, %s30_s20, [#allocation6], %s766_s17, %s766_s17, %s767_s18  }
   0x9   :  { %759 = dma.done.wait [#allocation3], 256  }
   0xa   :  { %760 = vsyncadd [#allocation3], 4294967040 }
   0xb   :  { %761 = dma.done.wait [#allocation6], 5632  }
   0xc   :  { %762 = vsyncadd [#allocation6], 4294961664  ;;  %v49_v0 = vld [vmem:[#allocation5 + $0x18] sm:$0xff]  ;;  %v48_v1 = vld [vmem:[#allocation5 + $0x10] sm:$0xff]  ;;  %s769_s0 = smov 32   ;;  %vm90_vm0 = vcmask 261120  }
   0xd   :  { %109 = vmatpush.msra.mxu1 %v49_v0  ;;  %v69_v2 = vld [vmem:[#allocation5 + $0xb8] sm:$0xff]  ;;  %v47_v3 = vld [vmem:[#allocation5 + $0x8] sm:$0xff]  ;;  %v46_v5 = vld [vmem:[#allocation5] sm:$0xff]  ;;  %s770_s1 = smov 96   ;;  %s771_s21 = smov 64  }
   0xe   :  { %130 = vrot.lane.b32.xlu0 %v69_v2, %s769_s0  ;;  %v67_v4 = vld [vmem:[#allocation5 + $0xa8] sm:$0xff]  ;;  %v801_v6 = vld [vmem:[#allocation2] sm:$0xff]  ;;  %v66_v8 = vld [vmem:[#allocation5 + $0xa0] sm:$0xff]  ;;  %s773_s22 = smov [#allocation7]   ;;  %s604_s26 = sshll.u32 %s878_s2, 4  ;;  %s605_s26 = int_to_ptr.hbm [resolvable:$true] %s604_s26 }
   0xf   :  { %110 = vmatpush.msra.mxu1 %v48_v1  ;;  %126 = vrot.lane.b32.xlu1 %v67_v4, %s769_s0  ;;  %v68_v7 = vld [vmem:[#allocation5 + $0xb0] sm:$0xff]  ;;  %v805_v9 = vld [vmem:[#allocation2 + $0x8] sm:$0xff]  ;;  %v74_v11 = vld [vmem:[#allocation5 + $0xe0] sm:$0xff]  ;;  %s602_s23 = sshll.u32 %s773_s22, 4  ;;  %s603_s23 = int_to_ptr.vmem [resolvable:$true] %s602_s23 }
  0x10   :  { %v75_v18 = vld [vmem:[#allocation5 + $0xe8] sm:$0xff]  ;;  %v73_v62 = vld [vmem:[#allocation5 + $0xd8] sm:$0xff]  ;;  %v72_v63 = vld [vmem:[#allocation5 + $0xd0] sm:$0xff] }
  0x11   :  { %111 = vmatpush.msra.mxu1 %v47_v3  ;;  %280 = vmatpush.msra.mxu3 %v73_v62  ;;  %v71_v0 = vld [vmem:[#allocation5 + $0xc8] sm:$0xff]  ;;  %v70_v1 = vld [vmem:[#allocation5 + $0xc0] sm:$0xff] }
  0x13   :  { %112 = vmatpush.msra.mxu1 %v46_v5  ;;  %281 = vmatpush.msra.mxu3 %v72_v63 }
  0x14   :  { %618 = vmatmul.msk.f32.vlgmr.msra.gmra.mxu1 %vm90_vm0, %v801_v6 }
  0x15   :  { %282 = vmatpush.msra.mxu3 %v71_v0 }
  0x16   :  { %128 = vrot.lane.b32.xlu0 %v68_v7, %s769_s0 }
  0x17   :  { %124 = vrot.lane.b32.xlu1 %v66_v8, %s769_s0  ;;  %283 = vmatpush.msra.mxu3 %v70_v1 }
  0x1c   :  { %619 = vmatmul.msk.f32.gmra.mxu1 %vm90_vm0, %v805_v9 }
  0x80   :  { %v131_v10 = vpop.permute.xlu0 %130 }
  0x81   :  { %v127_v17 = vpop.permute.xlu1 %126 }
  0x88   :  { %v129_v13 = vpop.permute.xlu0 %128 }
  0x89   :  { %v125_v24 = vpop.permute.xlu1 %124 }
  0x91   :  { %v114_v12 = vpop.f32.mrf.mxu1 }
  0x92   :  { %v115_v14 = vadd.f32 %v114_v12, %v74_v11 }
  0x94   :  { %v138_v15 = vmul.f32 %v129_v13, %v115_v14  ;;  %v139_v16 = vmul.f32 %v131_v10, %v115_v14  ;;  %v136_v25 = vmul.f32 %v125_v24, %v115_v14  ;;  %v137_v26 = vmul.f32 %v127_v17, %v115_v14 }
  0x96   :  { %174 = vrot.lane.b32.xlu2 %v139_v16, %s770_s1  ;;  %172 = vrot.lane.b32.xlu0 %v138_v15, %s770_s1 }
  0x99   :  { %v117_v19 = vpop.f32.mrf.mxu1 }
  0x9a   :  { %v809_v20 = vadd.f32 %v117_v19, %v75_v18  ;;  %v53_v18 = vld [vmem:[#allocation5 + $0x38] sm:$0xff]  ;;  %v52_v19 = vld [vmem:[#allocation5 + $0x30] sm:$0xff] }
  0x9c   :  { %v142_v21 = vmul.f32 %v129_v13, %v809_v20  ;;  %v143_v22 = vmul.f32 %v131_v10, %v809_v20  ;;  %v141_v23 = vmul.f32 %v127_v17, %v809_v20  ;;  %v140_v27 = vmul.f32 %v125_v24, %v809_v20 }
  0x9e   :  { %215 = vrot.lane.b32.xlu1 %v142_v21, %s770_s1  ;;  %217 = vrot.lane.b32.xlu2 %v143_v22, %s770_s1 }
  0x9f   :  { %213 = vrot.lane.b32.xlu0 %v141_v23, %s770_s1 }
  0xa6   :  { %170 = vrot.lane.b32.xlu2 %v137_v26, %s770_s1  ;;  %168 = vrot.lane.b32.xlu1 %v136_v25, %s770_s1 }
  0xae   :  { %211 = vrot.lane.b32.xlu2 %v140_v27, %s770_s1 }
  0xb6   :  { %150 = vrot.lane.b32.xlu2 %v69_v2, %s771_s21 }
  0xbe   :  { %148 = vrot.lane.b32.xlu2 %v68_v7, %s771_s21 }
  0xc6   :  { %146 = vrot.lane.b32.xlu2 %v67_v4, %s771_s21 }
  0xce   :  { %144 = vrot.lane.b32.xlu2 %v66_v8, %s771_s21 }
  0xf0   :  { %v175_v28 = vpop.permute.xlu2 %174 }
  0xf1   :  { %620 = vmatpush.xpose.msk.msrb.mxu1 %vm90_vm0, %v175_v28 }
  0xf8   :  { %v218_v29 = vpop.permute.xlu2 %217 }
  0xf9   :  { %625 = vmatpush.xpose.msk.msra.mxu2 %vm90_vm0, %v218_v29 }
 0x100   :  { %v171_v30 = vpop.permute.xlu2 %170 }
 0x108   :  { %v173_v31 = vpop.permute.xlu0 %172  ;;  %v212_v32 = vpop.permute.xlu2 %211 }
 0x109   :  { %621 = vmatpush.xpose.msk.msrb.mxu1 %vm90_vm0, %v173_v31 }
 0x10d   :  { %622 = vmatpush.xpose.msk.msrb.mxu1 %vm90_vm0, %v171_v30 }
 0x110   :  { %v216_v33 = vpop.permute.xlu1 %215  ;;  %v151_v34 = vpop.permute.xlu2 %150 }
 0x111   :  { %626 = vmatpush.xpose.msk.msra.mxu2 %vm90_vm0, %v216_v33  ;;  %v214_v35 = vpop.permute.xlu0 %213  ;;  %v159_v36 = vmul.f32 %v151_v34, %v115_v14  ;;  %v163_v39 = vmul.f32 %v151_v34, %v809_v20 }
 0x115   :  { %627 = vmatpush.xpose.msk.msra.mxu2 %vm90_vm0, %v214_v35 }
 0x118   :  { %v149_v37 = vpop.permute.xlu2 %148  ;;  %v169_v38 = vpop.permute.xlu1 %168 }
 0x119   :  { %v162_v40 = vmul.f32 %v149_v37, %v809_v20  ;;  %v158_v41 = vmul.f32 %v149_v37, %v115_v14  ;;  %623 = vmatpush.xpose.msk.msrb.mxu1 %vm90_vm0, %v169_v38  ;;  %628 = vmatpush.xpose.msk.msra.mxu2 %vm90_vm0, %v212_v32 }
 0x11b   :  { %v659_v42 = vpack.i.bf16 %v162_v40, %v163_v39  ;;  %v649_v43 = vpack.i.bf16 %v158_v41, %v159_v36 }
 0x11c   :  { %624 = vmatmul.msk.f32.vlgmr.msrb.gmra.mxu1 %vm90_vm0, %v115_v14  ;;  %629 = vmatmul.msk.f32.vlgmr.msra.gmra.mxu2 %vm90_vm0, %v809_v20 }
 0x11d   :  { %650 = vrot.lane.b32.xlu2 %v649_v43, %s771_s21  ;;  %417 = vmatpush.msrb.mxu2 %v53_v18  ;;  %v65_v18 = vld [vmem:[#allocation5 + $0x98] sm:$0xff] }
 0x11f   :  { %418 = vmatpush.msrb.mxu2 %v52_v19  ;;  %v64_v19 = vld [vmem:[#allocation5 + $0x90] sm:$0xff] }
 0x120   :  { %v147_v44 = vpop.permute.xlu2 %146 }
 0x121   :  { %v157_v46 = vmul.f32 %v147_v44, %v115_v14  ;;  %v161_v60 = vmul.f32 %v147_v44, %v809_v20 }
 0x128   :  { %v145_v45 = vpop.permute.xlu2 %144 }
 0x129   :  { %v156_v47 = vmul.f32 %v145_v45, %v115_v14  ;;  %v160_v59 = vmul.f32 %v145_v45, %v809_v20  ;;  %v51_v20 = vld [vmem:[#allocation5 + $0x28] sm:$0xff]  ;;  %v50_v45 = vld [vmem:[#allocation5 + $0x20] sm:$0xff] }
 0x12a   :  { %419 = vmatpush.msrb.mxu2 %v51_v20  ;;  %v63_v20 = vld [vmem:[#allocation5 + $0x88] sm:$0xff] }
 0x12b   :  { %v654_v48 = vpack.i.bf16 %v156_v47, %v157_v46  ;;  %v664_v61 = vpack.i.bf16 %v160_v59, %v161_v60 }
 0x12c   :  { %420 = vmatpush.msrb.mxu2 %v50_v45  ;;  %v79_v45 = vld [vmem:[#allocation5 + $0x108] sm:$0xff] }
 0x12d   :  { %655 = vrot.lane.b32.xlu2 %v654_v48, %s771_s21  ;;  %v76_v48 = vld [vmem:[#allocation5 + $0xf0] sm:$0xff] }
 0x177   :  { %v651_v49 = vpop.permute.xlu2 %650 }
 0x178   :  { %v652_v50 = vunpack.i.l.bf16 %v651_v49  ;;  %v653_v51 = vunpack.i.h.bf16 %v651_v49 }
 0x17a   :  { %352 = vmatpush.msra.mxu0 %v652_v50 }
 0x17c   :  { %353 = vmatpush.msra.mxu0 %v653_v51 }
 0x187   :  { %v656_v52 = vpop.permute.xlu2 %655 }
 0x188   :  { %v657_v53 = vunpack.i.l.bf16 %v656_v52  ;;  %v658_v54 = vunpack.i.h.bf16 %v656_v52 }
 0x18a   :  { %354 = vmatpush.msra.mxu0 %v657_v53  ;;  %v77_v53 = vld [vmem:[#allocation5 + $0xf8] sm:$0xff] }
 0x18c   :  { %355 = vmatpush.msra.mxu0 %v658_v54 }
 0x18e   :  { %531 = vmatpush.msrb.mxu0 %v65_v18 }
 0x190   :  { %532 = vmatpush.msrb.mxu0 %v64_v19 }
 0x192   :  { %533 = vmatpush.msrb.mxu0 %v63_v20 }
 0x199   :  { %v204_v55 = vpop.f32.mrf.mxu1 }
 0x19a   :  { %v250_v56 = vsel %vm90_vm0, %v204_v55, -inf }
 0x19b   :  { %251 = vmax.xlane.f32.xlu0 %v250_v56 }
 0x19f   :  { %v247_v57 = vpop.f32.mrf.mxu2 }
 0x1a0   :  { %v253_v58 = vsel %vm90_vm0, %v247_v57, -inf }
 0x1a1   :  { %254 = vmax.xlane.f32.xlu1 %v253_v58  ;;  %v772_v58 = vmov 32.0  }
 0x1af   :  { %660 = vrot.lane.b32.xlu0 %v659_v42, %s771_s21 }
 0x1ba   :  { %665 = vrot.lane.b32.xlu1 %v664_v61, %s771_s21 }
 0x20e   :  { %v252_v2 = vpop.xlane.xlu0 %251 }
 0x20f   :  { %v256_v3 = vsub.f32 %v204_v55, %v252_v2 }
 0x211   :  { %v258_v4 = vmul.f32 1.442695, %v256_v3 }
 0x213   :  { %669 = vpow2.f32 %v258_v4 }
 0x214   :  { %v255_v5 = vpop.xlane.xlu1 %254 }
 0x215   :  { %v257_v7 = vsub.f32 %v247_v57, %v255_v5 }
 0x217   :  { %v260_v8 = vmul.f32 1.442695, %v257_v7 }
 0x219   :  { %v670_v10 = vpop.eup %669  ;;  %671 = vpow2.f32 %v260_v8 }
 0x21a   :  { %630 = vmatmul.msk.f32.vlgmr.msra.gmra.mxu3 %vm90_vm0, %v670_v10 }
 0x21f   :  { %v672_v11 = vpop.eup %671 }
 0x221   :  { %v661_v12 = vpop.permute.xlu0 %660 }
 0x222   :  { %v662_v13 = vunpack.i.l.bf16 %v661_v12  ;;  %631 = vmatmul.msk.f32.gmra.mxu3 %vm90_vm0, %v672_v11  ;;  %v663_v14 = vunpack.i.h.bf16 %v661_v12  ;;  %v56_v12 = vld [vmem:[#allocation5 + $0x50] sm:$0xff] }
 0x224   :  { %391 = vmatpush.msra.mxu1 %v662_v13  ;;  %v55_v13 = vld [vmem:[#allocation5 + $0x48] sm:$0xff] }
 0x226   :  { %392 = vmatpush.msra.mxu1 %v663_v14  ;;  %v54_v14 = vld [vmem:[#allocation5 + $0x40] sm:$0xff] }
 0x22c   :  { %v666_v15 = vpop.permute.xlu1 %665 }
 0x22d   :  { %v667_v16 = vunpack.i.l.bf16 %v666_v15  ;;  %v668_v17 = vunpack.i.h.bf16 %v666_v15 }
 0x22f   :  { %393 = vmatpush.msra.mxu1 %v667_v16 }
 0x231   :  { %394 = vmatpush.msra.mxu1 %v668_v17 }
 0x29d   :  { %v285_v21 = vpop.f32.mrf.mxu3 }
 0x29e   :  { %673 = vrcp.f32 %v285_v21  ;;  %v302_v26 = vand.u32 2147483648, %v285_v21  ;;  %v300_v28 = vand.u32 2147483647, %v285_v21  ;;  %vm296_vm2 = vweird.f32 %v285_v21 }
 0x2a0   :  { %v303_v31 = vor.u32 1.1754944e-38, %v302_v26  ;;  %vm301_vm4 = vcmp.eq.f32.partialorder %v300_v28, 8.507059e+37  ;;  %v61_v26 = vld [vmem:[#allocation5 + $0x78] sm:$0xff] }
 0x2a4   :  { %v674_v22 = vpop.eup %673 }
 0x2a5   :  { %v292_v23 = vmul.f32 %v674_v22, %v285_v21  ;;  %v288_v24 = vpop.f32.mrf.mxu3  ;;  %vm297_vm1 = vweird.f32 %v674_v22 }
 0x2a6   :  { %675 = vrcp.f32 %v288_v24  ;;  %vm298_vm3 = vmor %vm296_vm2, %vm297_vm1  ;;  %v317_v37 = vand.u32 2147483648, %v288_v24  ;;  %v315_v39 = vand.u32 2147483647, %v288_v24  ;;  %vm311_vm6 = vweird.f32 %v288_v24 }
 0x2a7   :  { %v293_v25 = vsub.f32 1.0, %v292_v23  ;;  %677 = vrcp.f32 %v772_v58  ;;  %v62_v23 = vld [vmem:[#allocation5 + $0x80] sm:$0xff]  ;;  %vm516_vm1 = vcmask 523264  }
 0x2a8   :  { %v318_v41 = vor.u32 1.1754944e-38, %v317_v37  ;;  %vm316_vm8 = vcmp.eq.f32.partialorder %v315_v39, 8.507059e+37  ;;  %534 = vmatpush.msrb.mxu0 %v62_v23  ;;  %v80_v39 = vld [vmem:[#allocation5 + $0x110] sm:$0xff] }
 0x2a9   :  { %v294_v27 = vmul.f32 %v674_v22, %v293_v25 }
 0x2aa   :  { %535 = vmatpush.msrb.mxu0 %v61_v26 }
 0x2ab   :  { %v295_v29 = vadd.f32 %v674_v22, %v294_v27 }
 0x2ac   :  { %v676_v30 = vpop.eup %675 }
 0x2ad   :  { %v307_v32 = vmul.f32 %v676_v30, %v288_v24  ;;  %v299_v33 = vsel %vm298_vm3, %v674_v22, %v295_v29  ;;  %vm312_vm5 = vweird.f32 %v676_v30  ;;  %v678_v59 = vpop.eup %677 }
 0x2ae   :  { %v304_v34 = vsel %vm301_vm4, %v303_v31, %v299_v33  ;;  %vm313_vm7 = vmor %vm311_vm6, %vm312_vm5  ;;  %v437_v60 = vmul.f32 32.0, %v678_v59  ;;  %vm441_vm9 = vweird.f32 %v678_v59 }
 0x2af   :  { %v308_v35 = vsub.f32 1.0, %v307_v32  ;;  %v305_v36 = vmul.f32 %v670_v10, %v304_v34 }
 0x2b0   :  { %v438_v61 = vsub.f32 1.0, %v437_v60 }
 0x2b1   :  { %v309_v38 = vmul.f32 %v676_v30, %v308_v35  ;;  %632 = vmatmul.msk.f32.vlgmr.msra.gmra.mxu0 %vm90_vm0, %v305_v36  ;;  %v78_v36 = vld [vmem:[#allocation5 + $0x100] sm:$0xff] }
 0x2b2   :  { %v439_v62 = vmul.f32 %v678_v59, %v438_v61  ;;  %v84_v61 = vld [vmem:[#allocation5 + $0x130] sm:$0xff] }
 0x2b3   :  { %v310_v40 = vadd.f32 %v676_v30, %v309_v38 }
 0x2b4   :  { %v440_v63 = vadd.f32 %v678_v59, %v439_v62 }
 0x2b5   :  { %v314_v42 = vsel %vm313_vm7, %v676_v30, %v310_v40 }
 0x2b6   :  { %v319_v43 = vsel %vm316_vm8, %v318_v41, %v314_v42 }
 0x2b7   :  { %v320_v44 = vmul.f32 %v672_v11, %v319_v43  ;;  %v57_v11 = vld [vmem:[#allocation5 + $0x58] sm:$0xff] }
 0x2b8   :  { %503 = vmatpush.msrb.mxu3 %v57_v11 }
 0x2b9   :  { %633 = vmatmul.msk.f32.vlgmr.msra.gmra.mxu1 %vm90_vm0, %v320_v44 }
 0x2ba   :  { %504 = vmatpush.msrb.mxu3 %v56_v12 }
 0x2bc   :  { %505 = vmatpush.msrb.mxu3 %v55_v13 }
 0x2be   :  { %506 = vmatpush.msrb.mxu3 %v54_v14 }
 0x32e   :  { %v357_v46 = vpop.f32.mrf.mxu0 }
 0x32f   :  { %634 = vmatmul.msk.f32.vlgmr.msrb.gmra.mxu2 %vm90_vm0, %v357_v46 }
 0x336   :  { %v396_v47 = vpop.f32.mrf.mxu1 }
 0x337   :  { %635 = vmatmul.msk.f32.gmra.mxu2 %vm90_vm0, %v396_v47  ;;  %v81_v47 = vld [vmem:[#allocation5 + $0x118] sm:$0xff] }
 0x3b2   :  { %v422_v49 = vpop.f32.mrf.mxu2 }
 0x3b3   :  { %v423_v50 = vadd.f32 %v422_v49, %v76_v48 }
 0x3b5   :  { %v428_v51 = vadd.f32 %v423_v50, %v801_v6  ;;  %v850_v6 = vsel %vm441_vm9, %v678_v59, %v440_v63  ;;  %v60_v50 = vld [vmem:[#allocation5 + $0x70] sm:$0xff] }
 0x3b6   :  { %536 = vmatpush.msrb.mxu0 %v60_v50 }
 0x3b7   :  { %v430_v52 = vsel %vm90_vm0, %v428_v51, 0.0 }
 0x3b8   :  { %431 = vadd.xlane.f32.xlu2 %v430_v52  ;;  %v58_v52 = vld [vmem:[#allocation5 + $0x60] sm:$0xff] }
 0x3ba   :  { %v425_v54 = vpop.f32.mrf.mxu2 }
 0x3bb   :  { %v426_v55 = vadd.f32 %v425_v54, %v77_v53  ;;  %v82_v53 = vld [vmem:[#allocation5 + $0x120] sm:$0xff] }
 0x3bd   :  { %v429_v56 = vadd.f32 %v426_v55, %v805_v9 }
 0x3bf   :  { %v433_v57 = vsel %vm90_vm0, %v429_v56, 0.0 }
 0x3c0   :  { %434 = vadd.xlane.f32.xlu0 %v433_v57  ;;  %v83_v57 = vld [vmem:[#allocation5 + $0x128] sm:$0xff] }
 0x42b   :  { %v432_v0 = vpop.xlane.xlu2 %431 }
 0x42c   :  { %v443_v1 = vmul.f32 %v850_v6, %v432_v0 }
 0x42e   :  { %v445_v2 = vsub.f32 %v428_v51, %v443_v1  ;;  %v59_v51 = vld [vmem:[#allocation5 + $0x68] sm:$0xff] }
 0x42f   :  { %537 = vmatpush.msrb.mxu0 %v59_v51 }
 0x430   :  { %v447_v3 = vmul.f32 %v445_v2, %v445_v2 }
 0x431   :  { %538 = vmatpush.msrb.mxu0 %v58_v52 }
 0x432   :  { %v449_v9 = vsel %vm90_vm0, %v447_v3, 0.0 }
 0x433   :  { %450 = vadd.xlane.f32.xlu1 %v449_v9  ;;  %v435_v4 = vpop.xlane.xlu0 %434 }
 0x434   :  { %v444_v5 = vmul.f32 %v850_v6, %v435_v4 }
 0x436   :  { %v446_v7 = vsub.f32 %v429_v56, %v444_v5 }
 0x438   :  { %v448_v8 = vmul.f32 %v446_v7, %v446_v7 }
 0x43a   :  { %v452_v10 = vsel %vm90_vm0, %v448_v8, 0.0 }
 0x43b   :  { %453 = vadd.xlane.f32.xlu2 %v452_v10 }
 0x4a6   :  { %v451_v15 = vpop.xlane.xlu1 %450 }
 0x4a7   :  { %v455_v16 = vmul.f32 %v451_v15, %v850_v6 }
 0x4a9   :  { %v457_v17 = vadd.f32 1e-05, %v455_v16 }
 0x4ab   :  { %679 = vrsqrt.f32 %v457_v17  ;;  %vm465_vm11 = vweird.f32 %v457_v17 }
 0x4ae   :  { %v454_v21 = vpop.xlane.xlu2 %453 }
 0x4af   :  { %v456_v22 = vmul.f32 %v454_v21, %v850_v6 }
 0x4b1   :  { %v680_v24 = vpop.eup %679  ;;  %v458_v25 = vadd.f32 1e-05, %v456_v22 }
 0x4b2   :  { %v460_v27 = vmul.f32 %v680_v24, %v457_v17  ;;  %vm466_vm10 = vweird.f32 %v680_v24 }
 0x4b3   :  { %681 = vrsqrt.f32 %v458_v25  ;;  %vm467_vm12 = vmor %vm465_vm11, %vm466_vm10  ;;  %vm475_vm14 = vweird.f32 %v458_v25 }
 0x4b4   :  { %v461_v28 = vmul.f32 %v680_v24, %v460_v27 }
 0x4b6   :  { %v462_v29 = vmul.f32 0.5, %v461_v28 }
 0x4b8   :  { %v463_v30 = vsub.f32 1.5, %v462_v29 }
 0x4b9   :  { %v682_v31 = vpop.eup %681 }
 0x4ba   :  { %v464_v32 = vmul.f32 %v680_v24, %v463_v30  ;;  %v470_v33 = vmul.f32 %v682_v31, %v458_v25  ;;  %vm476_vm13 = vweird.f32 %v682_v31 }
 0x4bb   :  { %vm477_vm15 = vmor %vm475_vm14, %vm476_vm13 }
 0x4bc   :  { %v468_v34 = vsel %vm467_vm12, %v680_v24, %v464_v32  ;;  %v471_v35 = vmul.f32 %v682_v31, %v470_v33  ;;  %v86_v32 = vld [vmem:[#allocation5 + $0x140] sm:$0xff] }
 0x4bd   :  { %v479_v37 = vmul.f32 %v468_v34, %v445_v2  ;;  %v85_v2 = vld [vmem:[#allocation5 + $0x138] sm:$0xff] }
 0x4be   :  { %v472_v38 = vmul.f32 0.5, %v471_v35 }
 0x4bf   :  { %v481_v40 = vmul.f32 %v479_v37, %v78_v36  ;;  %v88_v37 = vld [vmem:[#allocation5 + $0x150] sm:$0xff] }
 0x4c0   :  { %v473_v41 = vsub.f32 1.5, %v472_v38 }
 0x4c1   :  { %v483_v42 = vadd.f32 %v481_v40, %v80_v39 }
 0x4c2   :  { %v474_v43 = vmul.f32 %v682_v31, %v473_v41  ;;  %v87_v41 = vld [vmem:[#allocation5 + $0x148] sm:$0xff] }
 0x4c3   :  { %636 = vmatmul.msk.f32.vlgmr.msrb.gmra.mxu3 %vm90_vm0, %v483_v42 }
 0x4c4   :  { %v478_v44 = vsel %vm477_vm15, %v682_v31, %v474_v43 }
 0x4c5   :  { %v480_v46 = vmul.f32 %v478_v44, %v446_v7  ;;  %v89_v44 = vld [vmem:[#allocation5 + $0x158] sm:$0xff] }
 0x4c7   :  { %v482_v48 = vmul.f32 %v480_v46, %v79_v45 }
 0x4c9   :  { %v484_v49 = vadd.f32 %v482_v48, %v81_v47 }
 0x4cb   :  { %637 = vmatmul.msk.f32.gmra.mxu3 %vm90_vm0, %v484_v49 }
 0x546   :  { %v508_v54 = vpop.f32.mrf.mxu3 }
 0x547   :  { %v509_v55 = vadd.f32 %v508_v54, %v82_v53 }
 0x549   :  { %v514_v56 = vmax.f32 %v509_v55, 0.0 }
 0x54b   :  { %638 = vmatmul.msk.f32.vlgmr.msrb.gmra.mxu0 %vm516_vm1, %v514_v56 }
 0x54e   :  { %v511_v58 = vpop.f32.mrf.mxu3 }
 0x54f   :  { %v512_v59 = vadd.f32 %v511_v58, %v83_v57 }
 0x551   :  { %v515_v60 = vmax.f32 %v512_v59, 0.0 }
 0x553   :  { %639 = vmatmul.msk.f32.gmra.mxu0 %vm516_vm1, %v515_v60 }
 0x5c8   :  { %v540_v62 = vpop.f32.mrf.mxu0 }
 0x5c9   :  { %v541_v63 = vadd.f32 %v540_v62, %v84_v61 }
 0x5cb   :  { %v546_v0 = vadd.f32 %v541_v63, %v483_v42 }
 0x5cd   :  { %v548_v1 = vsel %vm90_vm0, %v546_v0, 0.0 }
 0x5ce   :  { %549 = vadd.xlane.f32.xlu2 %v548_v1 }
 0x5d0   :  { %v543_v3 = vpop.f32.mrf.mxu0 }
 0x5d1   :  { %v544_v9 = vadd.f32 %v543_v3, %v85_v2 }
 0x5d3   :  { %v547_v4 = vadd.f32 %v544_v9, %v484_v49 }
 0x5d5   :  { %v551_v5 = vsel %vm90_vm0, %v547_v4, 0.0 }
 0x5d6   :  { %552 = vadd.xlane.f32.xlu0 %v551_v5 }
 0x641   :  { %v550_v7 = vpop.xlane.xlu2 %549 }
 0x642   :  { %v554_v8 = vmul.f32 %v550_v7, %v850_v6 }
 0x644   :  { %v556_v10 = vsub.f32 %v546_v0, %v554_v8 }
 0x646   :  { %v558_v11 = vmul.f32 %v556_v10, %v556_v10 }
 0x648   :  { %v560_v12 = vsel %vm90_vm0, %v558_v11, 0.0 }
 0x649   :  { %v553_v13 = vpop.xlane.xlu0 %552  ;;  %561 = vadd.xlane.f32.xlu2 %v560_v12 }
 0x64a   :  { %v555_v14 = vmul.f32 %v553_v13, %v850_v6 }
 0x64c   :  { %v557_v15 = vsub.f32 %v547_v4, %v555_v14 }
 0x64e   :  { %v559_v16 = vmul.f32 %v557_v15, %v557_v15 }
 0x650   :  { %v563_v17 = vsel %vm90_vm0, %v559_v16, 0.0 }
 0x651   :  { %564 = vadd.xlane.f32.xlu1 %v563_v17 }
 0x6bc   :  { %v562_v18 = vpop.xlane.xlu2 %561 }
 0x6bd   :  { %v566_v19 = vmul.f32 %v562_v18, %v850_v6 }
 0x6bf   :  { %v568_v20 = vadd.f32 1e-05, %v566_v19 }
 0x6c1   :  { %683 = vrsqrt.f32 %v568_v20  ;;  %vm576_vm3 = vweird.f32 %v568_v20 }
 0x6c4   :  { %v565_v21 = vpop.xlane.xlu1 %564 }
 0x6c5   :  { %v567_v22 = vmul.f32 %v565_v21, %v850_v6 }
 0x6c7   :  { %v684_v23 = vpop.eup %683  ;;  %v569_v24 = vadd.f32 1e-05, %v567_v22 }
 0x6c8   :  { %v571_v25 = vmul.f32 %v684_v23, %v568_v20  ;;  %vm577_vm2 = vweird.f32 %v684_v23 }
 0x6c9   :  { %685 = vrsqrt.f32 %v569_v24  ;;  %vm578_vm4 = vmor %vm576_vm3, %vm577_vm2  ;;  %vm586_vm6 = vweird.f32 %v569_v24 }
 0x6ca   :  { %v572_v26 = vmul.f32 %v684_v23, %v571_v25 }
 0x6cc   :  { %v573_v27 = vmul.f32 0.5, %v572_v26 }
 0x6ce   :  { %v574_v28 = vsub.f32 1.5, %v573_v27 }
 0x6cf   :  { %v686_v29 = vpop.eup %685 }
 0x6d0   :  { %v575_v30 = vmul.f32 %v684_v23, %v574_v28  ;;  %v581_v31 = vmul.f32 %v686_v29, %v569_v24  ;;  %vm587_vm5 = vweird.f32 %v686_v29 }
 0x6d1   :  { %vm588_vm7 = vmor %vm586_vm6, %vm587_vm5 }
 0x6d2   :  { %v579_v33 = vsel %vm578_vm4, %v684_v23, %v575_v30  ;;  %v582_v34 = vmul.f32 %v686_v29, %v581_v31 }
 0x6d3   :  { %v590_v35 = vmul.f32 %v579_v33, %v556_v10 }
 0x6d4   :  { %v583_v36 = vmul.f32 0.5, %v582_v34 }
 0x6d5   :  { %v592_v6 = vmul.f32 %v590_v35, %v86_v32 }
 0x6d6   :  { %v584_v38 = vsub.f32 1.5, %v583_v36 }
 0x6d7   :  { %v594_v39 = vadd.f32 %v592_v6, %v88_v37 }
 0x6d8   :  { %v585_v40 = vmul.f32 %v686_v29, %v584_v38 }
 0x6d9   :  { %596 = vst.msk [vmem:[#allocation7] sm:$0xff] %vm90_vm0, %v594_v39 }
 0x6da   :  { %v589_v42 = vsel %vm588_vm7, %v686_v29, %v585_v40 }
 0x6db   :  { %v591_v43 = vmul.f32 %v589_v42, %v557_v15 }
 0x6dd   :  { %v593_v45 = vmul.f32 %v591_v43, %v87_v41 }
 0x6df   :  { %v595_v46 = vadd.f32 %v593_v45, %v89_v44 }
 0x6e1   :  { %597 = vst.msk [vmem:[#allocation7 + $0x8] sm:$0xff] %vm90_vm0, %v595_v46 }
 0x6e2   :  { %610 = dma.vmem_to_hbm [thread:$0]  %s603_s23, 256, %s605_s26, [#allocation4], %s766_s17, %s766_s17, %s767_s18  }
 0x6e3   :  { %763 = dma.done.wait [#allocation4], 256  }
 0x6e4   :  { %764 = vsyncadd [#allocation4], 4294967040 }
 0x6e5   :  { %615 = vsyncpa [#allocation3], 1 }
 0x6e6   :  { %616 = vsyncpa [#allocation6], 1 }
 0x6e7   :  { %617 = vsyncpa [#allocation4], 1 }

</bundles_post_ra>
